<compile_context>
chip_gen: v6e
topology: v6e:2x2x1
jax: 0.10.0
libtpu: 0.0.40
codegen_flags: <defaults>
</compile_context>

<pallas_src>
import numpy as np
import jax
import jax.numpy as jnp
from jax.experimental import pallas as pl
from jax.experimental.pallas import tpu as pltpu


def _round_up(x, m):
    return ((x + m - 1) // m) * m


# ----------------------------------------------------------------------------- kernel
def _graph_conv_kernel(slot_ref, xs_ref, xn_ref, ws_ref, wn_ref, b_ref, o_ref):
    # slot_ref : SMEM int32[n_tiles]          per-tile degree-slot ids (prefetched)
    # xs_ref   : bf16 (TM, in_p)              self features of this row tile
    # xn_ref   : bf16 (TM, in_p)              neighbor-sum features of this row tile
    # ws_ref   : bf16 (S, in_p, out_p)        per-slot self weights  (VMEM-resident)
    # wn_ref   : bf16 (S, in_p, out_p)        per-slot rel  weights  (VMEM-resident)
    # b_ref    : f32  (S, 1, out_p)           per-slot combined bias (VMEM-resident)
    # o_ref    : f32  (TM, out_p)
    slot = slot_ref[pl.program_id(0)]
    acc = jnp.dot(xs_ref[...], ws_ref[slot], preferred_element_type=jnp.float32)
    acc = acc + jnp.dot(xn_ref[...], wn_ref[slot], preferred_element_type=jnp.float32)
    acc = acc + b_ref[slot]
    # default activation of GraphConvLayer is 'relu'
    o_ref[...] = jnp.maximum(acc, 0.0).astype(o_ref.dtype)


# ----------------------------------------------------------------------------- wrapper
def graph_conv_layer_forward(atom_features, deg_slice, deg_adj_lists, params,
                             *, min_deg=0, max_deg=4, tile_rows=128):
    """Pallas GraphConvLayer forward.

    atom_features : (n_atoms, in_dim) f32, sorted by degree
    deg_slice     : host int array (max_deg+1-min_deg, 2) of (begin, size)
                    (static graph-structure metadata, as in the PyTorch module)
    deg_adj_lists : list, deg_adj_lists[d-1] int32 (n_deg_d, d) neighbor indices
    params        : dict with W_rel/b_rel/W_self/b_self lists (deg 1..max_deg),
                    and W0/b0 for degree 0 (if min_deg == 0).
                    Weights are (in_dim, out_dim), biases (out_dim,).
    tile_rows     : row tile (MXU M dimension); 128 default, 256-512 for big graphs.

    Note: MXU operands are cast to bf16 (f32 accumulation); expect ~1e-2-level
    differences vs. a pure-f32 reference.
    """
    atoms = atom_features.astype(jnp.float32)
    n_atoms, in_dim = atoms.shape
    out_dim = (params["W_self"][0].shape[1] if max_deg >= 1
               else params["W0"].shape[1])
    num_slots = max_deg + 1 - min_deg
    TM = int(tile_rows)
    in_p = _round_up(in_dim, 128)     # lane-dense K
    out_p = _round_up(out_dim, 128)   # lane-dense output (unmasked vst)
    deg_slice = np.asarray(deg_slice)

    # ---- per-degree self / neighbor-sum row blocks (row- and lane-padded) ----
    # TODO(synk): the per-degree neighbor gather/sum is a data-dependent gather
    # and is left to XLA; the degree-grouped linear layers + bias + relu run in
    # the Pallas kernel below.
    xs_blocks, xn_blocks = [], []
    tile_slot_ids, padded_begin = [], []
    row_cursor = 0
    for slot in range(num_slots):
        deg = slot + min_deg
        begin = int(deg_slice[slot, 0])
        size = int(deg_slice[slot, 1])
        padded_begin.append(row_cursor)
        if size == 0:
            continue
        self_blk = atoms[begin:begin + size]                      # (size, in_dim)
        if deg == 0:
            nbr_blk = jnp.zeros((size, in_dim), jnp.float32)
        else:
            idx = deg_adj_lists[deg - 1]                          # (size, deg)
            nbr_blk = jnp.sum(atoms[idx], axis=1)                 # f32 sum
        padded = _round_up(size, TM)
        pad_rc = ((0, padded - size), (0, in_p - in_dim))
        xs_blocks.append(jnp.pad(self_blk, pad_rc).astype(jnp.bfloat16))
        xn_blocks.append(jnp.pad(nbr_blk, pad_rc).astype(jnp.bfloat16))
        tile_slot_ids += [slot] * (padded // TM)
        row_cursor += padded

    r_pad = row_cursor
    n_tiles = r_pad // TM
    if n_tiles == 0:                                              # empty graph guard
        return jnp.zeros((0, out_dim), jnp.float32)

    xs = jnp.concatenate(xs_blocks, axis=0)                       # (r_pad, in_p) bf16
    xn = jnp.concatenate(xn_blocks, axis=0)                       # (r_pad, in_p) bf16
    slot_ids = jnp.asarray(tile_slot_ids, dtype=jnp.int32)

    # ---- resident per-degree weight / bias stacks (lane-padded, bf16) --------
    ws_rows, wn_rows, b_rows = [], [], []
    zero_w = jnp.zeros((in_dim, out_dim), jnp.float32)
    pad_wc = ((0, in_p - in_dim), (0, out_p - out_dim))
    for slot in range(num_slots):
        deg = slot + min_deg
        if deg == 0:
            w_self, w_rel, b = params["W0"], zero_w, params["b0"]
        else:
            w_self = params["W_self"][deg - 1]
            w_rel = params["W_rel"][deg - 1]
            b = params["b_self"][deg - 1] + params["b_rel"][deg - 1]
        ws_rows.append(jnp.pad(jnp.asarray(w_self, jnp.float32), pad_wc))
        wn_rows.append(jnp.pad(jnp.asarray(w_rel, jnp.float32), pad_wc))
        b_rows.append(jnp.pad(jnp.asarray(b, jnp.float32),
                              (0, out_p - out_dim)).reshape(1, out_p))
    w_self_stk = jnp.stack(ws_rows, axis=0).astype(jnp.bfloat16)  # (S, in_p, out_p)
    w_rel_stk = jnp.stack(wn_rows, axis=0).astype(jnp.bfloat16)   # (S, in_p, out_p)
    b_stk = jnp.stack(b_rows, axis=0)                             # (S, 1, out_p) f32

    # VMEM budget: resident weight stacks + double-buffered row tiles + output,
    # with 2x headroom; capped at 48 MiB (v7x has 64 MiB per TensorCore).
    resident = 2 * num_slots * in_p * out_p * 2 + num_slots * out_p * 4
    streamed = 2 * (2 * TM * in_p * 2) + 2 * (TM * out_p * 4)
    vmem_limit = int(min(48 * 2**20, max(16 * 2**20, 2 * (resident + streamed))))

    cost = pl.CostEstimate(
        flops=2 * r_pad * (2 * in_p) * out_p,
        transcendentals=0,
        bytes_accessed=(xs.size + xn.size) * 2 + r_pad * out_p * 4
                       + (w_self_stk.size + w_rel_stk.size) * 2 + b_stk.size * 4,
    )

    out_pad = pl.pallas_call(
        _graph_conv_kernel,
        out_shape=jax.ShapeDtypeStruct((r_pad, out_p), jnp.float32),
        grid_spec=pltpu.PrefetchScalarGridSpec(
            num_scalar_prefetch=1,
            grid=(n_tiles,),
            in_specs=[
                # streamed row tiles (pipelined, independent across the grid)
                pl.BlockSpec((TM, in_p), lambda t, sid: (t, 0)),
                pl.BlockSpec((TM, in_p), lambda t, sid: (t, 0)),
                # weight / bias stacks: full-array blocks with constant index_map
                # -> DMA'd once and kept VMEM-resident; slot picked in-kernel.
                pl.BlockSpec((num_slots, in_p, out_p), lambda t, sid: (0, 0, 0)),
                pl.BlockSpec((num_slots, in_p, out_p), lambda t, sid: (0, 0, 0)),
                pl.BlockSpec((num_slots, 1, out_p), lambda t, sid: (0, 0, 0)),
            ],
            out_specs=pl.BlockSpec((TM, out_p), lambda t, sid: (t, 0)),
        ),
        compiler_params=pltpu.CompilerParams(
            dimension_semantics=("parallel",),
            vmem_limit_bytes=vmem_limit,
        ),
        cost_estimate=cost,
    )(slot_ids, xs, xn, w_self_stk, w_rel_stk, b_stk)

    # Drop padding rows/lanes; output stays in degree-slot concatenation order,
    # exactly like torch.cat(new_rel_atoms_collection, dim=0).
    gather_idx = np.concatenate([
        np.arange(padded_begin[s], padded_begin[s] + int(deg_slice[s, 1]))
        for s in range(num_slots)
    ]).astype(np.int32)
    return out_pad[jnp.asarray(gather_idx), :out_dim]


# ----------------------------------------------------------------------------- reference
def graph_conv_layer_ref(atoms, deg_slice, deg_adj_lists, params, *, min_deg, max_deg):
    """Plain-JAX (f32) port of GraphConvLayer.forward (for correctness checking)."""
    deg_slice = np.asarray(deg_slice)
    collection = [None] * (max_deg + 1 - min_deg)
    for deg in range(1, max_deg + 1):
        idx = deg_adj_lists[deg - 1]
        nbr = jnp.sum(atoms[idx], axis=1)
        begin = int(deg_slice[deg - min_deg, 0])
        size = int(deg_slice[deg - min_deg, 1])
        self_atoms = atoms[begin:begin + size]
        rel_out = nbr @ params["W_rel"][deg - 1] + params["b_rel"][deg - 1]
        self_out = self_atoms @ params["W_self"][deg - 1] + params["b_self"][deg - 1]
        collection[deg - min_deg] = rel_out + self_out
    if min_deg == 0:
        begin = int(deg_slice[0, 0])
        size = int(deg_slice[0, 1])
        self_atoms = atoms[begin:begin + size]
        collection[0] = self_atoms @ params["W0"] + params["b0"]
    out = jnp.concatenate(collection, axis=0)
    return jax.nn.relu(out)


# ----------------------------------------------------------------------------- demo
if __name__ == "__main__":
    key = jax.random.PRNGKey(0)
    in_dim, out_dim = 32, 32
    min_deg, max_deg = 0, 4

    # atoms sorted by degree: counts per degree 0..4
    sizes = [2, 4, 6, 4, 2]
    n_atoms = int(np.sum(sizes))
    begins = np.concatenate([[0], np.cumsum(sizes)[:-1]])
    deg_slice = np.stack([begins, np.asarray(sizes)], axis=1).astype(np.int32)

    keys = iter(jax.random.split(key, 32))
    atoms = jax.random.normal(next(keys), (n_atoms, in_dim), dtype=jnp.float32)

    deg_adj_lists = []
    for deg in range(1, max_deg + 1):
        deg_adj_lists.append(
            jax.random.randint(next(keys), (sizes[deg], deg), 0, n_atoms,
                               dtype=jnp.int32))

    def linear_init(k, fan_in, fan_out):
        kw, kb = jax.random.split(k)
        scale = 1.0 / np.sqrt(fan_in)
        w = jax.random.uniform(kw, (fan_in, fan_out), jnp.float32, -scale, scale)
        b = jax.random.uniform(kb, (fan_out,), jnp.float32, -scale, scale)
        return w, b

    params = {"W_rel": [], "b_rel": [], "W_self": [], "b_self": []}
    for deg in range(1, max_deg + 1):
        w, b = linear_init(next(keys), in_dim, out_dim)
        params["W_rel"].append(w); params["b_rel"].append(b)
        w, b = linear_init(next(keys), in_dim, out_dim)
        params["W_self"].append(w); params["b_self"].append(b)
    params["W0"], params["b0"] = linear_init(next(keys), in_dim, out_dim)

    out = graph_conv_layer_forward(atoms, deg_slice, deg_adj_lists, params,
                                   min_deg=min_deg, max_deg=max_deg,
                                   tile_rows=128)
    out = jax.block_until_ready(out)

    ref = graph_conv_layer_ref(atoms, deg_slice, deg_adj_lists, params,
                               min_deg=min_deg, max_deg=max_deg)

    assert out.shape == (n_atoms, out_dim) and out.dtype == jnp.float32
    # Tolerance accounts for bf16 MXU operands (f32 accumulation) in the kernel.
    assert jnp.allclose(out, ref, atol=5e-2, rtol=5e-2), \
        float(jnp.max(jnp.abs(out - ref)))
    print("KERNEL_OK")
</pallas_src>

<mosaic_0001>
module attributes {stable_mosaic.version = 11 : i64} {
  func.func @_graph_conv_kernel(%arg0: i32, %arg1: memref<5xi32, #tpu.memory_space<smem>>, %arg2: memref<128x128xbf16, #tpu.memory_space<vmem>>, %arg3: memref<128x128xbf16, #tpu.memory_space<vmem>>, %arg4: memref<5x128x128xbf16, #tpu.memory_space<vmem>>, %arg5: memref<5x128x128xbf16, #tpu.memory_space<vmem>>, %arg6: memref<5x1x128xf32, #tpu.memory_space<vmem>>, %arg7: memref<128x128xf32, #tpu.memory_space<vmem>>) attributes {dimension_semantics = [#tpu.dimension_semantics<parallel>], iteration_bounds = array<i64: 5>, scalar_prefetch = 1 : i64, scratch_operands = 0 : i64, tpu.core_type = #tpu.core_type<tc>, window_params = [{transform_indices = @transform_0, window_bounds = array<i64: 128, 128>}, {transform_indices = @transform_1, window_bounds = array<i64: 128, 128>}, {pipeline_mode = #tpu.pipeline_mode<synchronous>, transform_indices = @transform_2, window_bounds = array<i64: 5, 128, 128>}, {pipeline_mode = #tpu.pipeline_mode<synchronous>, transform_indices = @transform_3, window_bounds = array<i64: 5, 128, 128>}, {pipeline_mode = #tpu.pipeline_mode<synchronous>, transform_indices = @transform_4, window_bounds = array<i64: 5, 1, 128>}, {transform_indices = @transform_5, window_bounds = array<i64: 128, 128>}]} {
    %0 = arith.index_cast %arg0 : i32 to index
    %1 = memref.load %arg1[%0] : memref<5xi32, #tpu.memory_space<smem>>
    %c0 = arith.constant 0 : index
    %c0_0 = arith.constant 0 : index
    %2 = vector.load %arg2[%c0, %c0_0] : memref<128x128xbf16, #tpu.memory_space<vmem>>, vector<128x128xbf16>
    %3 = arith.index_cast %1 : i32 to index
    %c0_1 = arith.constant 0 : index
    %c0_2 = arith.constant 0 : index
    %4 = vector.load %arg4[%3, %c0_1, %c0_2] : memref<5x128x128xbf16, #tpu.memory_space<vmem>>, vector<1x128x128xbf16>
    %5 = vector.shape_cast %4 : vector<1x128x128xbf16> to vector<128x128xbf16>
    %cst = arith.constant dense<0.000000e+00> : vector<128x128xf32>
    %6 = tpu.matmul %2, %5, %cst {dimension_numbers = #tpu.dot_dimension_numbers<[1], [0], [0], [1], [0, 0, 1, 1], [], []>} : vector<128x128xbf16>, vector<128x128xbf16>, vector<128x128xf32> -> vector<128x128xf32>
    %c0_3 = arith.constant 0 : index
    %c0_4 = arith.constant 0 : index
    %7 = vector.load %arg3[%c0_3, %c0_4] : memref<128x128xbf16, #tpu.memory_space<vmem>>, vector<128x128xbf16>
    %8 = arith.index_cast %1 : i32 to index
    %c0_5 = arith.constant 0 : index
    %c0_6 = arith.constant 0 : index
    %9 = vector.load %arg5[%8, %c0_5, %c0_6] : memref<5x128x128xbf16, #tpu.memory_space<vmem>>, vector<1x128x128xbf16>
    %10 = vector.shape_cast %9 : vector<1x128x128xbf16> to vector<128x128xbf16>
    %cst_7 = arith.constant dense<0.000000e+00> : vector<128x128xf32>
    %11 = tpu.matmul %7, %10, %cst_7 {dimension_numbers = #tpu.dot_dimension_numbers<[1], [0], [0], [1], [0, 0, 1, 1], [], []>} : vector<128x128xbf16>, vector<128x128xbf16>, vector<128x128xf32> -> vector<128x128xf32>
    %12 = arith.addf %6, %11 : vector<128x128xf32>
    %13 = arith.index_cast %1 : i32 to index
    %c0_8 = arith.constant 0 : index
    %c0_9 = arith.constant 0 : index
    %14 = vector.load %arg6[%13, %c0_8, %c0_9] : memref<5x1x128xf32, #tpu.memory_space<vmem>>, vector<1x1x128xf32>
    %15 = vector.shape_cast %14 : vector<1x1x128xf32> to vector<1x128xf32>
    %16 = vector.broadcast %15 : vector<1x128xf32> to vector<128x128xf32>
    %17 = arith.addf %12, %16 : vector<128x128xf32>
    %cst_10 = arith.constant 0.000000e+00 : f32
    %18 = vector.broadcast %cst_10 : f32 to vector<128x128xf32>
    %19 = arith.maximumf %17, %18 : vector<128x128xf32>
    %c0_11 = arith.constant 0 : index
    %c0_12 = arith.constant 0 : index
    %20 = vector.load %arg7[%c0_11, %c0_12] : memref<128x128xf32, #tpu.memory_space<vmem>>, vector<128x128xf32>
    tpu.vector_store %arg7[%c0_11, %c0_12], %19 {strides = array<i32>} : memref<128x128xf32, #tpu.memory_space<vmem>>, vector<128x128xf32>,
    return
  }
  func.func @transform_0(%arg0: i32, %arg1: memref<5xi32, #tpu.memory_space<smem>>) -> (i32, i32) {
    %c0_i32 = arith.constant 0 : i32
    %c0_i32_0 = arith.constant 0 : i32
    return %arg0, %c0_i32 : i32, i32
  }
  func.func @transform_1(%arg0: i32, %arg1: memref<5xi32, #tpu.memory_space<smem>>) -> (i32, i32) {
    %c0_i32 = arith.constant 0 : i32
    %c0_i32_0 = arith.constant 0 : i32
    return %arg0, %c0_i32 : i32, i32
  }
  func.func @transform_2(%arg0: i32, %arg1: memref<5xi32, #tpu.memory_space<smem>>) -> (i32, i32, i32) {
    %c0_i32 = arith.constant 0 : i32
    %c0_i32_0 = arith.constant 0 : i32
    %c0_i32_1 = arith.constant 0 : i32
    %c0_i32_2 = arith.constant 0 : i32
    return %c0_i32, %c0_i32_0, %c0_i32_1 : i32, i32, i32
  }
  func.func @transform_3(%arg0: i32, %arg1: memref<5xi32, #tpu.memory_space<smem>>) -> (i32, i32, i32) {
    %c0_i32 = arith.constant 0 : i32
    %c0_i32_0 = arith.constant 0 : i32
    %c0_i32_1 = arith.constant 0 : i32
    %c0_i32_2 = arith.constant 0 : i32
    return %c0_i32, %c0_i32_0, %c0_i32_1 : i32, i32, i32
  }
  func.func @transform_4(%arg0: i32, %arg1: memref<5xi32, #tpu.memory_space<smem>>) -> (i32, i32, i32) {
    %c0_i32 = arith.constant 0 : i32
    %c0_i32_0 = arith.constant 0 : i32
    %c0_i32_1 = arith.constant 0 : i32
    %c0_i32_2 = arith.constant 0 : i32
    return %c0_i32, %c0_i32_0, %c0_i32_1 : i32, i32, i32
  }
  func.func @transform_5(%arg0: i32, %arg1: memref<5xi32, #tpu.memory_space<smem>>) -> (i32, i32) {
    %c0_i32 = arith.constant 0 : i32
    %c0_i32_0 = arith.constant 0 : i32
    return %arg0, %c0_i32 : i32, i32
  }
}

</mosaic_0001>

<bundles_post_ra>
// kernel: tpu_custom_call.1
= control target key start
LH: loop header
LB: loop body
LE: loop exit
PB: predicated region body
PF: predicated region fallthrough
CT: control target
= control target key end

     0   :  { %s1431_s21 = smov [#allocation3]   ;;  %s1811_s0 = inlined_call_operand.hbm [shape: s32[5], index: 0, kind: input, shape index: {}]   ;;  %s1812_s1 = inlined_call_operand.hbm [shape: bf16[640,128], index: 1, kind: input, shape index: {}]   ;;  %s1813_s2 = inlined_call_operand.hbm [shape: bf16[640,128], index: 2, kind: input, shape index: {}]   ;;  %s1814_s3 = inlined_call_operand.hbm [shape: bf16[5,128,128], index: 3, kind: input, shape index: {}]   ;;  %s1815_s4 = inlined_call_operand.hbm [shape: bf16[5,128,128], index: 4, kind: input, shape index: {}]   ;;  %s1816_s5 = inlined_call_operand.vmem [shape: f32[5,1,128], index: 5, kind: input, shape index: {}]   ;;  %s1817_s6 = inlined_call_operand.hbm [shape: f32[640,128], index: 6, kind: output, shape index: {}]  }
   0x1   :  { %1825 = sst [smem:[#allocation19_spill]] %s1812_s1 }
   0x2   :  { %1826 = sst [smem:[#allocation20_spill]] %s1814_s3 }
   0x3   :  { %12 = dma.hbm_to_smem %s1811_s0, 16, %s1431_s21, [#allocation2] }
   0x4   :  { %1393 = dma.done.wait [#allocation2], 16 }
   0x5   :  { %1394 = vsyncadd [#allocation2], 4294967280 }
   0x6   :  { %14 = sfence }
   0x7   :  { %15 = vsyncpa [#allocation5], 0 }
   0x8   :  { %17 = vsyncpa [#allocation5 + $0x1], 0 }
   0x9   :  { %18 = vsyncpa [#allocation8], 0 }
   0xa   :  { %20 = vsyncpa [#allocation8 + $0x1], 0 }
   0xb   :  { %21 = vsyncpa [#allocation11], 0 }
   0xc   :  { %22 = vsyncpa [#allocation6], 0 }
   0xd   :  { %24 = vsyncpa [#allocation6 + $0x1], 0  ;;  %s1479_s24 = smov 0   ;;  %s1481_s25 = smov 0  }
   0xe   :  { %s1483_s26 = smov 0   ;;  %s1485_s27 = smov 0  }
   0xf LB: > { %s1500_s0 = sadd.s32 4294967295, %s1429_s27   ;;  %s967_s28 = sadd.s32 4294967294, %s1429_s27   ;;  %s1429_s27 = sphi %s1485_s27, %s1847_s27   ;;  %s1425_s26 = sphi %s1483_s26, %s1846_s26   ;;  %s1421_s25 = sphi %s1481_s25, %s1845_s25   ;;  %s1417_s24 = sphi %s1479_s24, %s1844_s24  }
  0x10   : > { %p50_p0 = scmp.ne.s32.totalorder %s1421_s25, %s1417_s24  ;;  %p1822_p1 = scmp.eq.s32.totalorder %s1500_s0, 0 }
  0x11   : > { %p163_p2 = scmp.eq.s32.totalorder %s1500_s0, 4  ;;  %p169_p3 = scmp.eq.s32.totalorder %s967_s28, 4 }
  0x12   : > { %p1509_p4 = por %p1822_p1, %p50_p0  ;;  %p968_p5 = scmp.ge.s32.totalorder %s1429_s27, 1 }
  0x13   : > { %p1514_p6 = por %p169_p3, %p50_p0  ;;  %p176_p7 = scmp.lt.s32.totalorder %s1429_s27, 6 }
  0x14   : > { %s1827_s29 = scalar_select %p1509_p4, 1, 0 }
  0x15   : > { %s1828_s30 = scalar_select %p1514_p6, 1, 0 }
  0x16   : > { %p1519_p8 = pnand %p968_p5, %p176_p7  ;;  %s1432_s8 = smov [#allocation9]  }
  0x17   : > { %s188_s9 = sshll.u32 %s1432_s8, 4  ;;  %s1433_s11 = smov [#allocation10]   ;;  %s189_s9 = int_to_ptr.vmem [resolvable:$true] %s188_s9 }
  0x18   : > { %p1140_p9 = pneg %p1519_p8  ;;  %s201_s12 = sshll.u32 %s1433_s11, 4  ;;  %s202_s12 = int_to_ptr.vmem [resolvable:$true] %s201_s12 }
  0x19   : > { %s1254_s13 = scalar_lea.vmem %s189_s9, 5120  ;;  %p1262_p3 = scmp.lt.s32.totalorder %s189_s9, %s189_s9 }
  0x1a   : > { %p1527_p10 = pnand %p1140_p9, %p1822_p1  ;;  %p1255_p12 = scmp.ne.s32.totalorder %s189_s9, %s1254_s13 }
  0x1b   : > { %p1263_p5 = scmp.lt.s32.totalorder %s1254_s13, %s1254_s13 }
  0x1c   : > { %p1245_p11 = pneg %p1527_p10 }
  0x1d   : > { %p1264_p7 = por %p1263_p5, %p1262_p3 }
  0x1e   : > { %p1257_p13 = pnand %p1255_p12, %p1245_p11 }
  0x20   : > { %p1258_p0 = pneg %p1257_p13 }
  0x22   : > { %p1265_p9 = pnand %p1264_p7, %p1258_p0 }
  0x24   : > { %1268 = shalt.err (!%p1265_p9)
}
  0x25   : > { %s1818_s14 = smov 64   ;;  %s1820_s15 = smov 4  }
  0x26   : > { %s1831_s3 = sld [smem:[#allocation20_spill]]  ;;  %s1280_s18 = scalar_lea.vmem %s202_s12, 5120 }
  0x27   : > { %p1281_p12 = scmp.ne.s32.totalorder %s202_s12, %s1280_s18  ;;  %p1288_p0 = scmp.lt.s32.totalorder %s202_s12, %s202_s12 }
  0x28   : > { %p1289_p5 = scmp.lt.s32.totalorder %s1280_s18, %s1280_s18 }
  0x29   : > { %p1283_p13 = pnand %p1281_p12, %p1245_p11 }
  0x2a   : > { %p1290_p7 = por %p1289_p5, %p1288_p0 }
  0x2b   : > { %p1284_p3 = pneg %p1283_p13 }
  0x2c   : > { %1143 = dma.hbm_to_vmem [thread:$0]  (!%p1527_p10), %s1831_s3, 5120, %s189_s9, [#allocation8], %s1818_s14, %s1818_s14, %s1820_s15  }
  0x2d   : > { %p1291_p9 = pnand %p1290_p7, %p1284_p3 }
  0x2f   : > { %1294 = shalt.err (!%p1291_p9)
}
  0x30   : > { %1146 = dma.hbm_to_vmem [thread:$0]  (!%p1527_p10), %s1815_s4, 5120, %s202_s12, [#allocation11], %s1818_s14, %s1818_s14, %s1820_s15  }
  0x31   : > { %s1556_s21 = sadd.s32 1, %s1429_s27   ;;  %s37_s22 = sadd.s32 1, %s1425_s26 }
  0x32   : > { %s34_s23 = ssub.s32 %s1429_s27, %s1556_s21  ;;  %p44_p11 = scmp.ne.s32.totalorder %s1425_s26, %s1421_s25 }
  0x33   : > { %p35_p12 = scmp.eq.s32.totalorder %s34_s23, 0  ;;  %p45_p13 = scmp.eq.s32.totalorder %s1429_s27, 0 }
  0x34   : > { %p1566_p3 = por %p163_p2, %p44_p11  ;;  %p1160_p0 = scmp.lt.s32.totalorder %s1429_s27, 5 }
  0x35   : > { %s1572_s8 = scalar_select %p35_p12, %s1425_s26, %s37_s22  }
  0x36   : > { %s1832_s28 = scalar_select %p1566_p3, 1, 0 }
  0x37   : > { %p46_p5 = por %p45_p13, %p44_p11  ;;  %s218_s9 = sand.u32 1, %s1425_s26  }
  0x38   : > { %s972_s10 = sshll.u32 %s218_s9, 6  ;;  %s1025_s11 = sshll.u32 %s1429_s27, 10 }
  0x39   : > { %s1833_s1 = sld [smem:[#allocation19_spill]]  ;;  %s222_s17 = scalar_lea.vmem [#allocation4], %s972_s10 }
  0x3a   : > { %s229_s18 = sshll.u32 %s222_s17, 4  ;;  %p1583_p2 = pnand %p1160_p0, %p46_p5  ;;  %s1581_s18 = int_to_ptr.vmem [resolvable:$true] %s229_s18 }
  0x3b   : > { %s1590_s23 = scalar_lea.hbm %s1813_s2, %s1025_s11  ;;  %s243_s12 = scalar_lea.vmem [#allocation7], %s972_s10 }
  0x3c   : > { %s1592_s13 = sshll.u32 %s243_s12, 4  ;;  %s1594_s14 = scalar_lea.sflag [#allocation5], %s218_s9  ;;  %s1625_s13 = int_to_ptr.vmem [resolvable:$true] %s1592_s13 }
  0x3d   : > { %p1297_p7 = pneg %p1583_p2 }
  0x3f   : > { %s1579_s16 = scalar_lea.hbm %s1833_s1, %s1025_s11  ;;  %s1300_s20 = scalar_lea.hbm %s1833_s1, 5120 }
  0x40   : > { %s1295_s15 = scalar_lea.hbm %s1579_s16, 1024  ;;  %p1301_p12 = scmp.lt.s32.totalorder %s1579_s16, %s1833_s1 }
  0x41   : > { %p1296_p10 = scmp.ne.s32.totalorder %s1579_s16, %s1295_s15  ;;  %p1302_p13 = scmp.lt.s32.totalorder %s1300_s20, %s1295_s15 }
  0x43   : > { %p1298_p9 = pnand %p1297_p7, %p1296_p10  ;;  %p1303_p0 = por %p1302_p13, %p1301_p12 }
  0x45   : > { %p1299_p11 = pneg %p1298_p9 }
  0x47   : > { %p1304_p5 = pnand %p1303_p0, %p1299_p11 }
  0x49   : > { %1307 = shalt.err (!%p1304_p5)
}
  0x4a   : > { %s1308_s9 = scalar_lea.vmem %s1581_s18, 1024  ;;  %s1436_s3 = smov [#allocation4]  }
  0x4b   : > { %p1309_p1 = scmp.ne.s32.totalorder %s1581_s18, %s1308_s9  ;;  %s1313_s10 = sshll.u32 %s1436_s3, 4  ;;  %s1314_s10 = int_to_ptr.vmem [resolvable:$false] %s1313_s10 }
  0x4c   : > { %s1315_s12 = scalar_lea.vmem %s1314_s10, 2048  ;;  %p1316_p6 = scmp.lt.s32.totalorder %s1581_s18, %s1314_s10 }
  0x4d   : > { %p1311_p10 = pnand %p1309_p1, %p1297_p7  ;;  %p1317_p3 = scmp.lt.s32.totalorder %s1315_s12, %s1308_s9 }
  0x4f   : > { %p1312_p9 = pneg %p1311_p10  ;;  %p1318_p4 = por %p1317_p3, %p1316_p6 }
  0x51   : > { %p1319_p12 = pnand %p1318_p4, %p1312_p9 }
  0x53   : > { %1322 = shalt.err (!%p1319_p12)
}
  0x54   : > { %s1835_s15 = smov 4   ;;  %s1836_s17 = smov 64  }
  0x55   : > { %1150 = dma.hbm_to_vmem [thread:$0]  (!%p1583_p2), %s1579_s16, 1024, %s1581_s18, %s1594_s14, %s1836_s17, %s1836_s17, %s1835_s15  }
  0x56   : > { %s239_s20 = sand.u32 1, %s1429_s27   ;;  %s1323_s11 = scalar_lea.hbm %s1590_s23, 1024 }
  0x57   : > { %s240_s22 = scalar_lea.sflag [#allocation8], %s239_s20  ;;  %p1324_p1 = scmp.ne.s32.totalorder %s1590_s23, %s1323_s11 }
  0x58   : > { %s1328_s10 = scalar_lea.hbm %s1813_s2, 5120  ;;  %p1329_p3 = scmp.lt.s32.totalorder %s1590_s23, %s1813_s2 }
  0x59   : > { %p1326_p4 = pnand %p1324_p1, %p1297_p7  ;;  %p1330_p11 = scmp.lt.s32.totalorder %s1328_s10, %s1323_s11 }
  0x5b   : > { %p1327_p6 = pneg %p1326_p4  ;;  %p1331_p13 = por %p1330_p11, %p1329_p3 }
  0x5d   : > { %p1332_p0 = pnand %p1331_p13, %p1327_p6 }
  0x5f   : > { %1335 = shalt.err (!%p1332_p0)
}
  0x60   : > { %s1336_s14 = scalar_lea.vmem %s1625_s13, 1024  ;;  %s1437_s16 = smov [#allocation7]  }
  0x61   : > { %p1337_p5 = scmp.ne.s32.totalorder %s1625_s13, %s1336_s14  ;;  %s1341_s18 = sshll.u32 %s1437_s16, 4  ;;  %s1342_s18 = int_to_ptr.vmem [resolvable:$false] %s1341_s18 }
  0x62   : > { %s1343_s20 = scalar_lea.vmem %s1342_s18, 2048  ;;  %p1344_p12 = scmp.lt.s32.totalorder %s1625_s13, %s1342_s18 }
  0x63   : > { %p1339_p10 = pnand %p1337_p5, %p1297_p7  ;;  %p1345_p1 = scmp.lt.s32.totalorder %s1343_s20, %s1336_s14 }
  0x65   : > { %p1340_p9 = pneg %p1339_p10  ;;  %p1346_p4 = por %p1345_p1, %p1344_p12 }
  0x67   : > { %p1347_p3 = pnand %p1346_p4, %p1340_p9 }
  0x69   : > { %1350 = shalt.err (!%p1347_p3)
}
  0x6a   : > { %1153 = dma.hbm_to_vmem [thread:$0]  (!%p1583_p2), %s1590_s23, 1024, %s1625_s13, %s240_s22, %s1836_s17, %s1836_s17, %s1835_s15  }
  0x6b   : > { %262 = sbr.rel (%p1519_p8) target bundleno = 408 (0x198), region = 40  ;;  %s1656_s1 = sand.u32 (!%p1519_p8), 1, %s1421_s25  }
  0x6c   : > { %s979_s11 = sshll.u32 (!%p1519_p8), %s1656_s1, 6  ;;  %s265_s9 = scalar_lea.sflag (!%p1519_p8), [#allocation5], %s1656_s1 }
  0x6d   : > { %s1660_s3 = scalar_lea.vmem (!%p1519_p8), [#allocation4], %s979_s11  ;;  %p1837_p7 = scmp.ne.s32.totalorder (!%p1519_p8), %s1827_s29, 0 }
  0x70   : > { %1396 = dma.done.wait (%p1837_p7), %s265_s9, 1024  }
  0x71   : > { %1398 = vsyncadd (%p1837_p7), %s265_s9, 4294966272  ;;  %s273_s19 = sand.u32 1, %s1500_s0   ;;  %s1667_s23 = scalar_lea.vmem [#allocation7], %s979_s11 }
  0x72   : > { %s274_s7 = scalar_lea.sflag [#allocation8], %s273_s19 }
  0x73   : > { %1400 = dma.done.wait (%p1837_p7), %s274_s7, 1024  }
  0x74   : > { %1402 = vsyncadd (%p1837_p7), %s274_s7, 4294966272  ;;  %p1838_p8 = scmp.eq.s32.totalorder %s1500_s0, 0 }
  0x76   : > { %1404 = dma.done.wait (%p1838_p8), [#allocation8], 5120   ;;  %p1839_p2 = pmov %p1838_p8 }
  0x78   : > { %1406 = vsyncadd (%p1839_p2), [#allocation8], 4294962176  ;;  %p1840_p6 = pmov %p1839_p2 }
  0x79   : > { %p1841_p11 = pmov %p1839_p2 }
  0x7a   : > { %1408 = dma.done.wait (%p1840_p6), [#allocation11], 5120  }
  0x7b   : > { %1410 = vsyncadd (%p1841_p11), [#allocation11], 4294962176  ;;  %s1682_s13 = sld [smem:[#allocation3 + %s1500_s0]]  ;;  %v1219_v0 = vld [vmem:[%s1667_s23] sm:$0xff]   ;;  %v1221_v18 = vld [vmem:[%s1667_s23 + $0x8] sm:$0xff]   ;;  %s983_s14 = sshll.u32 %s1656_s1, 7 }
  0x7c   : > { %1078 = vmatprep.mubr.bf16.mxu0 %v1219_v0  ;;  %v1220_v12 = vld [vmem:[%s1660_s3] sm:$0xff]   ;;  %v1222_v19 = vld [vmem:[%s1660_s3 + $0x8] sm:$0xff]   ;;  %v1223_v20 = vld [vmem:[%s1667_s23 + $0x10] sm:$0xff]   ;;  %s1730_s16 = scalar_lea.vmem [#allocation12], %s983_s14  ;;  %s1029_s18 = sshll.u32 %s1500_s0, 11 }
  0x7d   : > { %1110 = vmatprep.mubr.bf16.mxu1 %v1220_v12  ;;  %v1224_v21 = vld [vmem:[%s1660_s3 + $0x10] sm:$0xff]   ;;  %v1225_v22 = vld [vmem:[%s1667_s23 + $0x18] sm:$0xff]   ;;  %v1227_v24 = vld [vmem:[%s1667_s23 + $0x20] sm:$0xff]   ;;  %s847_s20 = sshll.u32 %s1730_s16, 4  ;;  %s834_s19 = scalar_lea.sflag [#allocation6], %s1656_s1  ;;  %s1767_s20 = int_to_ptr.vmem [resolvable:$true] %s847_s20 }
  0x7e   : > { %v1226_v23 = vld [vmem:[%s1660_s3 + $0x18] sm:$0xff]   ;;  %v1228_v25 = vld [vmem:[%s1660_s3 + $0x20] sm:$0xff]   ;;  %v1229_v26 = vld [vmem:[%s1667_s23 + $0x28] sm:$0xff]   ;;  %s1351_s0 = scalar_lea.vmem %s1767_s20, 2048  ;;  %p1842_p0 = scmp.ne.s32.totalorder %s1832_s28, 0 }
  0x7f   : > { %v1230_v27 = vld [vmem:[%s1660_s3 + $0x28] sm:$0xff]   ;;  %v1231_v28 = vld [vmem:[%s1667_s23 + $0x30] sm:$0xff]   ;;  %v1233_v30 = vld [vmem:[%s1667_s23 + $0x38] sm:$0xff]   ;;  %p1352_p13 = scmp.ne.s32.totalorder %s1767_s20, %s1351_s0  ;;  %s1438_s7 = smov [#allocation12]  }
  0x80   : > { %v1232_v29 = vld [vmem:[%s1660_s3 + $0x30] sm:$0xff]   ;;  %v1234_v31 = vld [vmem:[%s1660_s3 + $0x38] sm:$0xff]   ;;  %s1765_s3 = scalar_lea.hbm %s1817_s6, %s1029_s18  ;;  %s1355_s23 = sshll.u32 %s1438_s7, 4  ;;  %s1356_s23 = int_to_ptr.vmem [resolvable:$false] %s1355_s23 }
  0x81   : > { %s1027_s15 = sshll.u32 %s1682_s13, 6  ;;  %s777_s12 = scalar_lea.vmem %s1816_s5, %s1682_s13 }
  0x82   : > { %s1686_s29 = scalar_lea.vmem [#allocation10], %s1027_s15  ;;  %s1689_s17 = scalar_lea.vmem [#allocation9], %s1027_s15  ;;  %v1725_v34 = vld [vmem:[%s777_s12] ss:$0 sm:$0xff] }
  0x83   : > { %v1203_v1 = vld [vmem:[%s1686_s29 + $0x38] sm:$0xff]   ;;  %v1205_v3 = vld [vmem:[%s1686_s29 + $0x30] sm:$0xff]   ;;  %v1207_v5 = vld [vmem:[%s1686_s29 + $0x28] sm:$0xff]   ;;  %p1353_p5 = pnand %p1352_p13, %p1842_p0  ;;  %s1357_s13 = scalar_lea.vmem %s1356_s23, 4096 }
  0x84   : > { %v1204_v2 = vld [vmem:[%s1689_s17 + $0x38] sm:$0xff]   ;;  %1062 = vmatprep.subr.bf16.mxu0 %v1203_v1  ;;  %v1206_v4 = vld [vmem:[%s1689_s17 + $0x30] sm:$0xff]   ;;  %v1208_v6 = vld [vmem:[%s1689_s17 + $0x28] sm:$0xff]   ;;  %p1358_p9 = scmp.lt.s32.totalorder %s1767_s20, %s1356_s23  ;;  %p1359_p12 = scmp.lt.s32.totalorder %s1357_s13, %s1351_s0 }
  0x85   : > { %1094 = vmatprep.subr.bf16.mxu1 %v1204_v2  ;;  %1063 = vmatpush3.bf16.msra.mxu0 %v1203_v1  ;;  %v1209_v7 = vld [vmem:[%s1686_s29 + $0x20] sm:$0xff]   ;;  %v1211_v9 = vld [vmem:[%s1686_s29 + $0x18] sm:$0xff]   ;;  %v1213_v11 = vld [vmem:[%s1686_s29 + $0x10] sm:$0xff]   ;;  %p1354_p10 = pneg %p1353_p5 }
  0x86   : > { %1095 = vmatpush3.bf16.msra.mxu1 %v1204_v2  ;;  %1064 = vmatprep.subr.bf16.mxu0 %v1205_v3  ;;  %v1210_v8 = vld [vmem:[%s1689_s17 + $0x20] sm:$0xff]   ;;  %v1212_v10 = vld [vmem:[%s1689_s17 + $0x18] sm:$0xff]   ;;  %v1214_v13 = vld [vmem:[%s1689_s17 + $0x10] sm:$0xff]   ;;  %p1360_p1 = por %p1359_p12, %p1358_p9 }
  0x87   : > { %1096 = vmatprep.subr.bf16.mxu1 %v1206_v4  ;;  %v1215_v14 = vld [vmem:[%s1686_s29 + $0x8] sm:$0xff]   ;;  %v1217_v16 = vld [vmem:[%s1686_s29] sm:$0xff]  }
  0x88   : > { %v1216_v15 = vld [vmem:[%s1689_s17 + $0x8] sm:$0xff]   ;;  %v1218_v17 = vld [vmem:[%s1689_s17] sm:$0xff]   ;;  %p1361_p4 = pnand %p1360_p1, %p1354_p10 }
  0x89   : > { %1065 = vmatpush3.bf16.msra.mxu0 %v1205_v3 }
  0x8a   : > { %1097 = vmatpush3.bf16.msra.mxu1 %v1206_v4  ;;  %1066 = vmatprep.subr.bf16.mxu0 %v1207_v5 }
  0x8b   : > { %1098 = vmatprep.subr.bf16.mxu1 %v1208_v6 }
  0x8d   : > { %1067 = vmatpush3.bf16.msra.mxu0 %v1207_v5 }
  0x8e   : > { %1099 = vmatpush3.bf16.msra.mxu1 %v1208_v6  ;;  %1068 = vmatprep.subr.bf16.mxu0 %v1209_v7 }
  0x8f   : > { %1100 = vmatprep.subr.bf16.mxu1 %v1210_v8 }
  0x91   : > { %1069 = vmatpush3.bf16.msra.mxu0 %v1209_v7 }
  0x92   : > { %1101 = vmatpush3.bf16.msra.mxu1 %v1210_v8  ;;  %1070 = vmatprep.subr.bf16.mxu0 %v1211_v9 }
  0x93   : > { %1102 = vmatprep.subr.bf16.mxu1 %v1212_v10 }
  0x95   : > { %1071 = vmatpush3.bf16.msra.mxu0 %v1211_v9 }
  0x96   : > { %1103 = vmatpush3.bf16.msra.mxu1 %v1212_v10  ;;  %1072 = vmatprep.subr.bf16.mxu0 %v1213_v11 }
  0x97   : > { %1104 = vmatprep.subr.bf16.mxu1 %v1214_v13 }
  0x99   : > { %1073 = vmatpush3.bf16.msra.mxu0 %v1213_v11 }
  0x9a   : > { %1105 = vmatpush3.bf16.msra.mxu1 %v1214_v13  ;;  %1074 = vmatprep.subr.bf16.mxu0 %v1215_v14 }
  0x9b   : > { %1106 = vmatprep.subr.bf16.mxu1 %v1216_v15 }
  0x9d   : > { %1075 = vmatpush3.bf16.msra.mxu0 %v1215_v14 }
  0x9e   : > { %1107 = vmatpush3.bf16.msra.mxu1 %v1216_v15  ;;  %1076 = vmatprep.subr.bf16.mxu0 %v1217_v16 }
  0x9f   : > { %1108 = vmatprep.subr.bf16.mxu1 %v1218_v17 }
  0xa1   : > { %1077 = vmatpush3.bf16.msra.mxu0 %v1217_v16 }
  0xa2   : > { %1109 = vmatpush3.bf16.msra.mxu1 %v1218_v17 }
  0xa4   : > { %1079 = vmatmul.mubr.bf16.vlgmr.msra.gmra.mxu0 %v1221_v18 }
  0xa5   : > { %1111 = vmatmul.mubr.bf16.vlgmr.msra.gmra.mxu1 %v1222_v19  ;;  %1082 = vmatprep.mubr.bf16.mxu0 %v1223_v20 }
  0xa6   : > { %1114 = vmatprep.mubr.bf16.mxu1 %v1224_v21 }
  0xac   : > { %1083 = vmatmul.mubr.bf16.gmra.mxu0 %v1225_v22 }
  0xad   : > { %1115 = vmatmul.mubr.bf16.gmra.mxu1 %v1226_v23  ;;  %1086 = vmatprep.mubr.bf16.mxu0 %v1227_v24 }
  0xae   : > { %1118 = vmatprep.mubr.bf16.mxu1 %v1228_v25 }
  0xb4   : > { %1087 = vmatmul.mubr.bf16.gmra.mxu0 %v1229_v26 }
  0xb5   : > { %1119 = vmatmul.mubr.bf16.gmra.mxu1 %v1230_v27  ;;  %1090 = vmatprep.mubr.bf16.mxu0 %v1231_v28 }
  0xb6   : > { %1122 = vmatprep.mubr.bf16.mxu1 %v1232_v29 }
  0xbc   : > { %1091 = vmatmul.mubr.bf16.gmra.mxu0 %v1233_v30 }
  0xbd   : > { %1123 = vmatmul.mubr.bf16.gmra.mxu1 %v1234_v31 }
 0x164   : > { %v1080_v32 = vpop.f32.mrf.mxu0 }
 0x165   : > { %v1112_v33 = vpop.f32.mrf.mxu1 }
 0x166   : > { %v723_v35 = vadd.f32 %v1112_v33, %v1080_v32  ;;  %v521_v36 = vpop.f32.mrf.mxu0 }
 0x167   : > { %v714_v37 = vpop.f32.mrf.mxu1 }
 0x168   : > { %v787_v38 = vadd.f32 %v1725_v34, %v723_v35  ;;  %v715_v39 = vadd.f32 %v714_v37, %v521_v36  ;;  %v1081_v40 = vpop.f32.mrf.mxu0 }
 0x169   : > { %v1113_v41 = vpop.f32.mrf.mxu1 }
 0x16a   : > { %v803_v42 = vmax.f32 %v787_v38, 0.0  ;;  %v785_v43 = vadd.f32 %v1725_v34, %v715_v39  ;;  %v726_v44 = vadd.f32 %v1113_v41, %v1081_v40  ;;  %v524_v45 = vpop.f32.mrf.mxu0 }
 0x16b   : > { %v717_v46 = vpop.f32.mrf.mxu1 }
 0x16c   : > { %819 = vst [vmem:[%s1730_s16 + $0x10] sm:$0xff] %v803_v42  ;;  %v801_v47 = vmax.f32 %v785_v43, 0.0  ;;  %v788_v48 = vadd.f32 %v1725_v34, %v726_v44  ;;  %v718_v49 = vadd.f32 %v717_v46, %v524_v45  ;;  %v1084_v50 = vpop.f32.mrf.mxu0 }
 0x16d   : > { %v1116_v51 = vpop.f32.mrf.mxu1 }
 0x16e   : > { %817 = vst [vmem:[%s1730_s16] sm:$0xff] %v801_v47  ;;  %v804_v52 = vmax.f32 %v788_v48, 0.0  ;;  %v786_v53 = vadd.f32 %v1725_v34, %v718_v49  ;;  %v739_v54 = vadd.f32 %v1116_v51, %v1084_v50  ;;  %v537_v55 = vpop.f32.mrf.mxu0 }
 0x16f   : > { %v730_v56 = vpop.f32.mrf.mxu1 }
 0x170   : > { %820 = vst [vmem:[%s1730_s16 + $0x18] sm:$0xff] %v804_v52  ;;  %v802_v57 = vmax.f32 %v786_v53, 0.0  ;;  %v791_v58 = vadd.f32 %v1725_v34, %v739_v54  ;;  %v731_v59 = vadd.f32 %v730_v56, %v537_v55  ;;  %v1085_v60 = vpop.f32.mrf.mxu0 }
 0x171   : > { %v1117_v61 = vpop.f32.mrf.mxu1 }
 0x172   : > { %818 = vst [vmem:[%s1730_s16 + $0x8] sm:$0xff] %v802_v57  ;;  %v807_v62 = vmax.f32 %v791_v58, 0.0  ;;  %v789_v63 = vadd.f32 %v1725_v34, %v731_v59  ;;  %v742_v0 = vadd.f32 %v1117_v61, %v1085_v60  ;;  %v540_v1 = vpop.f32.mrf.mxu0 }
 0x173   : > { %v733_v2 = vpop.f32.mrf.mxu1 }
 0x174   : > { %823 = vst [vmem:[%s1730_s16 + $0x30] sm:$0xff] %v807_v62  ;;  %v805_v3 = vmax.f32 %v789_v63, 0.0  ;;  %v792_v4 = vadd.f32 %v1725_v34, %v742_v0  ;;  %v734_v5 = vadd.f32 %v733_v2, %v540_v1  ;;  %v1088_v6 = vpop.f32.mrf.mxu0 }
 0x175   : > { %v1120_v7 = vpop.f32.mrf.mxu1 }
 0x176   : > { %821 = vst [vmem:[%s1730_s16 + $0x20] sm:$0xff] %v805_v3  ;;  %v808_v8 = vmax.f32 %v792_v4, 0.0  ;;  %v790_v9 = vadd.f32 %v1725_v34, %v734_v5  ;;  %v755_v10 = vadd.f32 %v1120_v7, %v1088_v6  ;;  %v553_v11 = vpop.f32.mrf.mxu0 }
 0x177   : > { %v746_v12 = vpop.f32.mrf.mxu1 }
 0x178   : > { %824 = vst [vmem:[%s1730_s16 + $0x38] sm:$0xff] %v808_v8  ;;  %v806_v13 = vmax.f32 %v790_v9, 0.0  ;;  %v795_v14 = vadd.f32 %v1725_v34, %v755_v10  ;;  %v747_v15 = vadd.f32 %v746_v12, %v553_v11  ;;  %v1089_v16 = vpop.f32.mrf.mxu0 }
 0x179   : > { %v1121_v17 = vpop.f32.mrf.mxu1 }
 0x17a   : > { %822 = vst [vmem:[%s1730_s16 + $0x28] sm:$0xff] %v806_v13  ;;  %v811_v18 = vmax.f32 %v795_v14, 0.0  ;;  %v793_v19 = vadd.f32 %v1725_v34, %v747_v15  ;;  %v758_v20 = vadd.f32 %v1121_v17, %v1089_v16  ;;  %v556_v21 = vpop.f32.mrf.mxu0 }
 0x17b   : > { %v749_v22 = vpop.f32.mrf.mxu1 }
 0x17c   : > { %827 = vst [vmem:[%s1730_s16 + $0x50] sm:$0xff] %v811_v18  ;;  %v809_v23 = vmax.f32 %v793_v19, 0.0  ;;  %v796_v24 = vadd.f32 %v1725_v34, %v758_v20  ;;  %v750_v25 = vadd.f32 %v749_v22, %v556_v21  ;;  %v1092_v26 = vpop.f32.mrf.mxu0 }
 0x17d   : > { %v1124_v27 = vpop.f32.mrf.mxu1 }
 0x17e   : > { %825 = vst [vmem:[%s1730_s16 + $0x40] sm:$0xff] %v809_v23  ;;  %v812_v28 = vmax.f32 %v796_v24, 0.0  ;;  %v794_v29 = vadd.f32 %v1725_v34, %v750_v25  ;;  %v771_v30 = vadd.f32 %v1124_v27, %v1092_v26  ;;  %v569_v31 = vpop.f32.mrf.mxu0 }
 0x17f   : > { %v762_v32 = vpop.f32.mrf.mxu1 }
 0x180   : > { %828 = vst [vmem:[%s1730_s16 + $0x58] sm:$0xff] %v812_v28  ;;  %v810_v33 = vmax.f32 %v794_v29, 0.0  ;;  %v799_v35 = vadd.f32 %v1725_v34, %v771_v30  ;;  %v763_v36 = vadd.f32 %v762_v32, %v569_v31  ;;  %v1093_v37 = vpop.f32.mrf.mxu0 }
 0x181   : > { %v1125_v38 = vpop.f32.mrf.mxu1 }
 0x182   : > { %826 = vst [vmem:[%s1730_s16 + $0x48] sm:$0xff] %v810_v33  ;;  %v815_v39 = vmax.f32 %v799_v35, 0.0  ;;  %v797_v40 = vadd.f32 %v1725_v34, %v763_v36  ;;  %v774_v41 = vadd.f32 %v1125_v38, %v1093_v37  ;;  %v572_v42 = vpop.f32.mrf.mxu0 }
 0x183   : > { %v765_v43 = vpop.f32.mrf.mxu1 }
 0x184   : > { %831 = vst [vmem:[%s1730_s16 + $0x70] sm:$0xff] %v815_v39  ;;  %v813_v44 = vmax.f32 %v797_v40, 0.0  ;;  %v800_v45 = vadd.f32 %v1725_v34, %v774_v41  ;;  %v766_v46 = vadd.f32 %v765_v43, %v572_v42 }
 0x186   : > { %829 = vst [vmem:[%s1730_s16 + $0x60] sm:$0xff] %v813_v44  ;;  %v816_v47 = vmax.f32 %v800_v45, 0.0  ;;  %v798_v48 = vadd.f32 %v1725_v34, %v766_v46 }
 0x188   : > { %832 = vst [vmem:[%s1730_s16 + $0x78] sm:$0xff] %v816_v47  ;;  %v814_v49 = vmax.f32 %v798_v48, 0.0 }
 0x18a   : > { %830 = vst [vmem:[%s1730_s16 + $0x68] sm:$0xff] %v814_v49 }
 0x18b   : > { %1364 = shalt.err (!%p1361_p4)
}
 0x18c   : > { %s1365_s15 = scalar_lea.hbm %s1765_s3, 2048  ;;  %s1369_s22 = scalar_lea.hbm %s1817_s6, 10240 }
 0x18d   : > { %p1366_p3 = scmp.ne.s32.totalorder %s1765_s3, %s1365_s15  ;;  %p1370_p2 = scmp.lt.s32.totalorder %s1765_s3, %s1817_s6 }
 0x18e   : > { %p1371_p6 = scmp.lt.s32.totalorder %s1369_s22, %s1365_s15 }
 0x18f   : > { %p1367_p7 = pnand %p1366_p3, %p1842_p0 }
 0x190   : > { %p1372_p11 = por %p1371_p6, %p1370_p2 }
 0x191   : > { %p1368_p8 = pneg %p1367_p7 }
 0x193   : > { %p1373_p13 = pnand %p1372_p11, %p1368_p8 }
 0x195   : > { %1376 = shalt.err (!%p1373_p13)
}
 0x196   : > { %s1439_s14 = smov 128   ;;  %s1440_s16 = smov 8  }
 0x197   : > { %1138 = dma.vmem_to_hbm [thread:$0]  (%p1842_p0), %s1767_s20, 2048, %s1765_s3, %s834_s19, %s1439_s14, %s1439_s14, %s1440_s16  }
 0x198 PF: > { %p1163_p5 = scmp.ge.s32.totalorder %s1429_s27, 2  ;;  %s862_s18 = sand.u32 1, %s1417_s24  }
 0x199   : > { %p1843_p10 = scmp.ne.s32.totalorder %s1828_s30, 0  ;;  %s863_s11 = scalar_lea.sflag [#allocation6], %s862_s18 }
 0x19b   : > { %p1155_p9 = pnand %p1163_p5, %p1843_p10 }
 0x19d   : > { %p1156_p12 = pneg %p1155_p9 }
 0x19f   : > { %1412 = dma.done.wait (%p1156_p12), %s863_s11, 2048  }
 0x1a0   : > { %1414 = vsyncadd (%p1156_p12), %s863_s11, 4294965248  ;;  %p27_p1 = scmp.ge.s32.totalorder %s1556_s21, 7   ;;  %s1844_s24 = smov %s1421_s25 }
 0x1a1   : > { %s1845_s25 = smov %s1425_s26  ;;  %s1846_s26 = smov %s1572_s8 }
 0x1a2   : > { %s1847_s27 = smov %s1556_s21  ;;  %29 = sbr.rel (!%p27_p1) target bundleno = 15 (0xf), region = 109 }
 0x1a7   :  { %868 = vsyncpa [#allocation5], 1 }
 0x1a8   :  { %870 = vsyncpa [#allocation5 + $0x1], 1 }
 0x1a9   :  { %871 = vsyncpa [#allocation8], 1 }
 0x1aa   :  { %873 = vsyncpa [#allocation8 + $0x1], 1 }
 0x1ab   :  { %874 = vsyncpa [#allocation11], 1 }
 0x1ac   :  { %875 = vsyncpa [#allocation6], 1 }
 0x1ad   :  { %877 = vsyncpa [#allocation6 + $0x1], 1 }

</bundles_post_ra>
